<compile_context>
chip_gen: v7x
topology: tpu7x:2x2x1
jax: 0.10.0
libtpu: 0.0.40
codegen_flags: <defaults>
</compile_context>

<pallas_src>
import math

import jax
import jax.numpy as jnp
from jax.experimental import pallas as pl
from jax.experimental.pallas import tpu as pltpu


def _simple_generator_kernel(x_ref, w1_ref, b1_ref, w2_ref, b2_ref, out_ref):
    # x_ref  : (B, input_dim)
    # w1_ref : (input_dim, bottleneck)     linear1 weight, pre-transposed
    # b1_ref : (1, bottleneck)             linear1 bias
    # w2_ref : (bottleneck, O_pad)         [weight_up | weight_down | bias_up | bias_down] fused
    # b2_ref : (1, O_pad)                  fused head biases (zero-padded)
    # out_ref: (B, O_pad)
    h = jnp.dot(x_ref[...], w1_ref[...], preferred_element_type=jnp.float32) + b1_ref[...]
    h = jnp.maximum(h, 0.0)  # ReLU
    y = jnp.dot(h, w2_ref[...], preferred_element_type=jnp.float32) + b2_ref[...]
    out_ref[...] = y.astype(out_ref.dtype)


def init_params(key, input_dim, bottleneck, hidden_size, adapter_dim):
    """Deterministic parameter init mirroring SimpleGenerator.__init__.
    All weights are stored (in, out), i.e. pre-transposed vs. nn.Linear."""
    k1, k2, k3, k4, k5, k6 = jax.random.split(key, 6)

    # nn.Linear default: U(-1/sqrt(in), 1/sqrt(in)) for weight and bias.
    lim1 = 1.0 / math.sqrt(input_dim)
    w1 = jax.random.uniform(k1, (input_dim, bottleneck), jnp.float32, -lim1, lim1)
    b1 = jax.random.uniform(k2, (1, bottleneck), jnp.float32, -lim1, lim1)

    # hyperfanin_init_weight: U(-b, b), b = 0.001*sqrt(3/(bottleneck*mainnet_in)); bias = 0.
    bw_up = 0.001 * math.sqrt(3.0 / (bottleneck * adapter_dim))
    w_up = jax.random.uniform(k3, (bottleneck, hidden_size * adapter_dim), jnp.float32, -bw_up, bw_up)
    bw_dn = 0.001 * math.sqrt(3.0 / (bottleneck * hidden_size))
    w_dn = jax.random.uniform(k4, (bottleneck, hidden_size * adapter_dim), jnp.float32, -bw_dn, bw_dn)

    # hyperfanin_init_bias: U(-b, b), b = 0.001*sqrt(3/bottleneck); bias = 0.
    bb = 0.001 * math.sqrt(3.0 / bottleneck)
    w_bu = jax.random.uniform(k5, (bottleneck, hidden_size), jnp.float32, -bb, bb)
    w_bd = jax.random.uniform(k6, (bottleneck, adapter_dim), jnp.float32, -bb, bb)

    return {
        "w1": w1, "b1": b1,
        "w_up": w_up, "b_up": jnp.zeros((hidden_size * adapter_dim,), jnp.float32),
        "w_dn": w_dn, "b_dn": jnp.zeros((hidden_size * adapter_dim,), jnp.float32),
        "w_bu": w_bu, "b_bu": jnp.zeros((hidden_size,), jnp.float32),
        "w_bd": w_bd, "b_bd": jnp.zeros((adapter_dim,), jnp.float32),
    }


def fuse_params(params, hidden_size, adapter_dim):
    """One-time setup: fuse the four output heads along the lane axis and pad the
    fused output dim to a multiple of 128 so the kernel's store is lane-dense."""
    w2 = jnp.concatenate([params["w_up"], params["w_dn"], params["w_bu"], params["w_bd"]], axis=1)
    b2 = jnp.concatenate([params["b_up"], params["b_dn"], params["b_bu"], params["b_bd"]])[None, :]
    o_total = w2.shape[1]
    o_pad = ((o_total + 127) // 128) * 128
    if o_pad != o_total:
        w2 = jnp.pad(w2, ((0, 0), (0, o_pad - o_total)))
        b2 = jnp.pad(b2, ((0, 0), (0, o_pad - o_total)))
    return {
        "w1": params["w1"], "b1": params["b1"],
        "w2": w2, "b2": b2,
        "hidden_size": hidden_size, "adapter_dim": adapter_dim, "o_total": o_total,
    }


def simple_generator_forward(x, fused):
    """Returns (weight_up, weight_down, bias_up, bias_down) like SimpleGenerator.forward."""
    B, _ = x.shape
    w1, b1, w2, b2 = fused["w1"], fused["b1"], fused["w2"], fused["b2"]
    hidden_size, adapter_dim = fused["hidden_size"], fused["adapter_dim"]
    o_pad = w2.shape[1]

    out = pl.pallas_call(
        _simple_generator_kernel,
        out_shape=jax.ShapeDtypeStruct((B, o_pad), jnp.float32),
        in_specs=[
            pl.BlockSpec(memory_space=pltpu.MemorySpace.VMEM),  # x
            pl.BlockSpec(memory_space=pltpu.MemorySpace.VMEM),  # w1
            pl.BlockSpec(memory_space=pltpu.MemorySpace.VMEM),  # b1
            pl.BlockSpec(memory_space=pltpu.MemorySpace.VMEM),  # fused w2
            pl.BlockSpec(memory_space=pltpu.MemorySpace.VMEM),  # fused b2
        ],
        out_specs=pl.BlockSpec(memory_space=pltpu.MemorySpace.VMEM),
    )(x, w1, b1, w2, b2)

    ha = hidden_size * adapter_dim
    weight_up = out[:, 0:ha]
    weight_down = out[:, ha:2 * ha]
    bias_up = out[:, 2 * ha:2 * ha + hidden_size]
    bias_down = out[:, 2 * ha + hidden_size:2 * ha + hidden_size + adapter_dim]
    return weight_up, weight_down, bias_up, bias_down


def reference(x, params):
    """Pure-JAX reference of the PyTorch forward."""
    h = jnp.maximum(x @ params["w1"] + params["b1"], 0.0)
    return (
        h @ params["w_up"] + params["b_up"],
        h @ params["w_dn"] + params["b_dn"],
        h @ params["w_bu"] + params["b_bu"],
        h @ params["w_bd"] + params["b_bd"],
    )


if __name__ == "__main__":
    # Small synthetic config:
    #   input_dim = 32, config.hypernetwork_bottleneck = 16,
    #   hidden_size = 32, adapter_dim = 4, batch = 2.
    B = 2
    INPUT_DIM = 32
    BOTTLENECK = 16
    HIDDEN_SIZE = 32
    ADAPTER_DIM = 4

    key = jax.random.PRNGKey(0)
    k_param, k_x = jax.random.split(key)
    params = init_params(k_param, INPUT_DIM, BOTTLENECK, HIDDEN_SIZE, ADAPTER_DIM)
    fused = fuse_params(params, HIDDEN_SIZE, ADAPTER_DIM)
    x = jax.random.normal(k_x, (B, INPUT_DIM), jnp.float32)

    w_up, w_dn, b_up, b_dn = simple_generator_forward(x, fused)
    jax.block_until_ready((w_up, w_dn, b_up, b_dn))

    r_up, r_dn, r_bu, r_bd = reference(x, params)
    assert w_up.shape == (B, HIDDEN_SIZE * ADAPTER_DIM)
    assert w_dn.shape == (B, HIDDEN_SIZE * ADAPTER_DIM)
    assert b_up.shape == (B, HIDDEN_SIZE)
    assert b_dn.shape == (B, ADAPTER_DIM)
    assert jnp.allclose(w_up, r_up, rtol=1e-4, atol=1e-5)
    assert jnp.allclose(w_dn, r_dn, rtol=1e-4, atol=1e-5)
    assert jnp.allclose(b_up, r_bu, rtol=1e-4, atol=1e-5)
    assert jnp.allclose(b_dn, r_bd, rtol=1e-4, atol=1e-5)

    print("KERNEL_OK")
</pallas_src>

<mosaic_0001>
module attributes {stable_mosaic.version = 11 : i64} {
  func.func @_simple_generator_kernel(%arg0: memref<2x32xf32, #tpu.memory_space<vmem>>, %arg1: memref<32x16xf32, #tpu.memory_space<vmem>>, %arg2: memref<1x16xf32, #tpu.memory_space<vmem>>, %arg3: memref<16x384xf32, #tpu.memory_space<vmem>>, %arg4: memref<1x384xf32, #tpu.memory_space<vmem>>, %arg5: memref<2x384xf32, #tpu.memory_space<vmem>>) attributes {dimension_semantics = [], scalar_prefetch = 0 : i64, scratch_operands = 0 : i64, tpu.core_type = #tpu.core_type<tc>} {
    %c0 = arith.constant 0 : index
    %c0_0 = arith.constant 0 : index
    %0 = vector.load %arg0[%c0, %c0_0] : memref<2x32xf32, #tpu.memory_space<vmem>>, vector<2x32xf32>
    %c0_1 = arith.constant 0 : index
    %c0_2 = arith.constant 0 : index
    %1 = vector.load %arg1[%c0_1, %c0_2] : memref<32x16xf32, #tpu.memory_space<vmem>>, vector<32x16xf32>
    %cst = arith.constant dense<0.000000e+00> : vector<2x16xf32>
    %2 = tpu.matmul %0, %1, %cst {dimension_numbers = #tpu.dot_dimension_numbers<[1], [0], [0], [1], [0, 0, 1, 1], [], []>} : vector<2x32xf32>, vector<32x16xf32>, vector<2x16xf32> -> vector<2x16xf32>
    %c0_3 = arith.constant 0 : index
    %c0_4 = arith.constant 0 : index
    %3 = vector.load %arg2[%c0_3, %c0_4] : memref<1x16xf32, #tpu.memory_space<vmem>>, vector<1x16xf32>
    %4 = vector.broadcast %3 : vector<1x16xf32> to vector<2x16xf32>
    %5 = arith.addf %2, %4 : vector<2x16xf32>
    %cst_5 = arith.constant 0.000000e+00 : f32
    %6 = vector.broadcast %cst_5 : f32 to vector<2x16xf32>
    %7 = arith.maximumf %5, %6 : vector<2x16xf32>
    %c0_6 = arith.constant 0 : index
    %c0_7 = arith.constant 0 : index
    %8 = vector.load %arg3[%c0_6, %c0_7] : memref<16x384xf32, #tpu.memory_space<vmem>>, vector<16x384xf32>
    %cst_8 = arith.constant dense<0.000000e+00> : vector<2x384xf32>
    %9 = tpu.matmul %7, %8, %cst_8 {dimension_numbers = #tpu.dot_dimension_numbers<[1], [0], [0], [1], [0, 0, 1, 1], [], []>} : vector<2x16xf32>, vector<16x384xf32>, vector<2x384xf32> -> vector<2x384xf32>
    %c0_9 = arith.constant 0 : index
    %c0_10 = arith.constant 0 : index
    %10 = vector.load %arg4[%c0_9, %c0_10] : memref<1x384xf32, #tpu.memory_space<vmem>>, vector<1x384xf32>
    %11 = vector.broadcast %10 : vector<1x384xf32> to vector<2x384xf32>
    %12 = arith.addf %9, %11 : vector<2x384xf32>
    %c0_11 = arith.constant 0 : index
    %c0_12 = arith.constant 0 : index
    %13 = vector.load %arg5[%c0_11, %c0_12] : memref<2x384xf32, #tpu.memory_space<vmem>>, vector<2x384xf32>
    tpu.vector_store %arg5[%c0_11, %c0_12], %12 {strides = array<i32>} : memref<2x384xf32, #tpu.memory_space<vmem>>, vector<2x384xf32>,
    return
  }
}

</mosaic_0001>

<bundles_post_ra>
// kernel: tpu_custom_call.1
= control target key start
LH: loop header
LB: loop body
LE: loop exit
PB: predicated region body
PF: predicated region fallthrough
CT: control target
= control target key end

     0   :  { %v383_v3 = vmov 0.0|0.0   ;;  %vm384_vm0 = vmmov 0   ;;  %v385_v6 = vmov 0.0   ;;  %s471_s0 = inlined_call_operand.vmem [shape: f32[2,32], index: 0, kind: input, shape index: {}]   ;;  %s472_s1 = inlined_call_operand.vmem [shape: f32[32,16], index: 1, kind: input, shape index: {}]   ;;  %s473_s2 = inlined_call_operand.vmem [shape: f32[1,16], index: 2, kind: input, shape index: {}]   ;;  %s474_s3 = inlined_call_operand.vmem [shape: f32[16,384], index: 3, kind: input, shape index: {}]   ;;  %s475_s4 = inlined_call_operand.vmem [shape: f32[1,384], index: 4, kind: input, shape index: {}]   ;;  %s476_s5 = inlined_call_operand.hbm [shape: f32[2,384], index: 5, kind: output, shape index: {}]  }
   0x1   :  { %v22_v0 = vld [vmem:[%s472_s1] sm:$0xff]  ;;  %v23_v1 = vld [vmem:[%s472_s1 + $0x8] sm:$0xff]  ;;  %v24_v2 = vld [vmem:[%s472_s1 + $0x10] sm:$0xff]  ;;  %341 = vmatprep.subr.bf16.mxu0 %v383_v3  ;;  %331 = vmatprep.mubr.msk.f32.mxu0 %vm384_vm0, %v385_v6 }
   0x2   :  { %v342_v4 = vpack.c.bf16 %v23_v1, %v22_v0  ;;  %v25_v5 = vld [vmem:[%s472_s1 + $0x18] sm:$0xff]  ;;  %199 = vmatprep.mubr.f32.mxu1 %v385_v6 }
   0x3   :  { %10 = vsyncpa [#allocation3], 0  ;;  %v345_v7 = vpack.c.bf16 %v25_v5, %v24_v2  ;;  %v21_v8 = vld [vmem:[%s471_s0] sm:$0x3]  ;;  %vm33_vm1 = vcmask 261120   ;;  %v109_v9 = vld [vmem:[%s474_s3 + $0x8] sm:$0xff]  ;;  %v116_v23 = vlaneseq }
   0x4   :  { %343 = vmatpush3.bf16.msra.mxu0 %v342_v4  ;;  %v112_v10 = vld [vmem:[%s474_s3 + $0x20] sm:$0xff]  ;;  %v111_v13 = vld [vmem:[%s474_s3 + $0x18] sm:$0xff]  ;;  %v110_v16 = vld [vmem:[%s474_s3 + $0x10] sm:$0xff]  ;;  %vm131_vm2 = vcmask 130048   ;;  %v386_v28 = vmov 1983009808  }
   0x5   :  { %344 = vmatprep.subr.bf16.mxu0 %v383_v3  ;;  %v347_v11 = vpack.c.bf16 %v112_v10, %v109_v9  ;;  %v108_v12 = vld [vmem:[%s474_s3] sm:$0xff]  ;;  %v113_v17 = vld [vmem:[%s474_s3 + $0x28] sm:$0xff]  ;;  %v117_v24 = vshrl.u32 %v116_v23, 7  ;;  %v281_v29 = vunpack.c.l.s4 %v386_v28  ;;  %s387_s3 = smov [#allocation2]  }
   0x6   :  { %v349_v14 = vpack.c.bf16 %v111_v13, %v108_v12  ;;  %v311_v15 = vld [vmem:[%s473_s2] ss:$0 sm:$0xff]  ;;  %v352_v21 = vpack.c.bf16 %v113_v17, %v110_v16 }
   0x7   :  { %348 = vmatprep.subr.bf16.mxu1 %v347_v11  ;;  %v118_v25 = vsub.s32 0, %v117_v24  ;;  %v114_v26 = vld [vmem:[%s475_s4] sm:$0x7]  ;;  %v122_v27 = vsub.s32 1, %v117_v24  ;;  %v126_v31 = vsub.s32 2, %v117_v24  ;;  %v282_v33 = vunpack.c.0.s8 %v281_v29  ;;  %s303_s4 = sshll.u32 %s387_s3, 4  ;;  %s304_s4 = int_to_ptr.vmem [resolvable:$true] %s303_s4 }
   0x8   :  { %346 = vmatpush3.bf16.msra.mxu0 %v345_v7  ;;  %350 = vmatpush1.bf16.msra.mxu1 %v349_v14  ;;  %s359_s16 = scalar_lea.vmem %s304_s4, 96  ;;  %p364_p1 = scmp.lt.s32.totalorder %s304_s4, %s304_s4 }
   0x9   :  { %351 = vmatprep.subr.bf16.mxu1 %v383_v3  ;;  %v119_v30 = vrot.slane %v114_v26, %v118_v25  ;;  %v123_v32 = vrot.slane %v114_v26, %v122_v27  ;;  %v127_v37 = vrot.slane %v114_v26, %v126_v31  ;;  %v285_v39 = vsub.s32 %v282_v33, %v117_v24  ;;  %p360_p0 = scmp.ne.s32.totalorder %s304_s4, %s359_s16  ;;  %p365_p2 = scmp.lt.s32.totalorder %s359_s16, %s359_s16 }
   0xb   :  { %332 = vmatmul.mubr.msk.f32.vlgmr.msra.gmra.mrb[0].mxu0 %vm33_vm1, %v21_v8  ;;  %p366_p3 = por %p365_p2, %p364_p1 }
   0xd   :  { %p367_p4 = pnand %p366_p3, %p360_p0 }
  0xde   :  { %v103_v18 = vpop.f32.mrb[0].mxu0 }
  0xdf   :  { %v104_v19 = vadd.f32 %v311_v15, %v103_v18  ;;  %v333_v20 = vpop.f32.mrb[1].mxu0 }
  0xe1   :  { %v107_v22 = vmax.f32 %v104_v19, 0.0 }
  0xe3   :  { %313 = vmatmul.mubr.msk.f32.vlgmr.msra.gmra.mrb[0].mxu1 %vm131_vm2, %v107_v22 }
  0xe4   :  { %353 = vmatpush3.bf16.msra.mxu1 %v352_v21  ;;  %338 = vmatprep.mubr.msk.f32.mxu1 %vm384_vm0, %v385_v6 }
  0xe7   :  { %339 = vmatmul.mubr.msk.f32.vlgmr.msra.gmra.mrb[2].mxu1 %vm131_vm2, %v107_v22 }
 0x1b6   :  { %v201_v34 = vpop.f32.mrb[0].mxu1 }
 0x1b7   :  { %v202_v35 = vadd.f32 %v201_v34, %v119_v30  ;;  %v203_v36 = vpop.f32.mrb[1].mxu1 }
 0x1b8   :  { %v204_v38 = vadd.f32 %v203_v36, %v123_v32 }
 0x1ba   :  { %v279_v40 = vcombine.low %v202_v35, %v204_v38  ;;  %v272_v41 = vpop.f32.mrb[2].mxu1 }
 0x1bb   :  { %v273_v42 = vadd.f32 %v272_v41, %v127_v37  ;;  %v340_v43 = vpop.f32.mrb[3].mxu1 }
 0x1bc   :  { %v286_v44 = vrot.slane %v279_v40, %v285_v39 }
 0x1bd   :  { %v293_v45 = vrot.slane %v273_v42, %v285_v39 }
 0x1bf   :  { %v294_v46 = vcombine.low %v286_v44, %v293_v45 }
 0x1c1   :  { %296 = vst [vmem:[#allocation2] sm:$0x3f] %v294_v46 }
 0x1c2   :  { %370 = shalt.err (!%p367_p4)
}
 0x1c3   :  { %s371_s19 = scalar_lea.hbm %s476_s5, 96 }
 0x1c4   :  { %p372_p5 = scmp.ne.s32.totalorder %s476_s5, %s371_s19  ;;  %p375_p6 = scmp.lt.u32.totalorder %s371_s19, %s476_s5 }
 0x1c6   :  { %p377_p7 = pnand %p375_p6, %p372_p5 }
 0x1c8   :  { %380 = shalt.err (!%p377_p7)
}
 0x1c9   :  { %306 = dma.vmem_to_hbm [thread:$0]  %s304_s4, 96, %s476_s5, [#allocation3]  }
 0x1ca   :  { %381 = dma.done.wait [#allocation3], 96  }
 0x1cb   :  { %382 = vsyncadd [#allocation3], 4294967200 }
 0x1cc   :  { %310 = vsyncpa [#allocation3], 1 }

</bundles_post_ra>
